<compile_context>
chip_gen: v6e
topology: v6e:2x2x1
jax: 0.10.0
libtpu: 0.0.40
codegen_flags: <defaults>
</compile_context>

<pallas_src>
import jax
import jax.numpy as jnp
from jax import lax
from jax.experimental import pallas as pl
from jax.experimental.pallas import tpu as pltpu


def _padded_bytes(shape, dtype):
    """VMEM footprint of an array including (sublane, lane) tile padding."""
    dtype = jnp.dtype(dtype)
    sub = {4: 8, 2: 16, 1: 32}.get(dtype.itemsize, 8)
    dims = list(shape) if len(shape) >= 2 else [1] + list(shape)
    dims[-1] = -(-dims[-1] // 128) * 128
    dims[-2] = -(-dims[-2] // sub) * sub
    n = 1
    for d in dims:
        n *= int(d)
    return n * dtype.itemsize


def _make_kernel(*, n_steps, n_tiles, tile_n, n_sub, feat):
    f32 = jnp.float32

    def kernel(adj_ref, gnorm_ref, bd_ref, bdrow_ref, selt_ref,
               gamma_ref, beta_ref, w1_ref, b1_ref, w2_ref, b2_ref,
               out_ref,
               y_prev, y_buf, t_acc, pt_ref, q_ref, rw_ref):
        i = pl.program_id(0)            # random-walk step (power i+1), sequential
        j = pl.program_id(1)            # adjacency column tile, sequential

        # ---- one-time init (first grid point) --------------------------------
        @pl.when(jnp.logical_and(i == 0, j == 0))
        def _():
            y_prev[...] = jnp.ones(y_prev.shape, y_prev.dtype)   # y_0 = 1^T (E all-ones)
            rw_ref[...] = jnp.zeros(rw_ref.shape, rw_ref.dtype)

        # ---- node-independent subgraph walk: once per step (j == 0) ----------
        @pl.when(jnp.logical_and(j == 0, i == 0))
        def _():
            pt_ref[...] = bdrow_ref[...]                         # Asub @ 1 (precomputed)

        @pl.when(jnp.logical_and(j == 0, i > 0))
        def _():
            pt_ref[...] = jnp.dot(pt_ref[...], bd_ref[...],
                                  preferred_element_type=f32)

        @pl.when(j == 0)
        def _():
            q_ref[...] = jnp.dot(pt_ref[...], selt_ref[...],
                                 preferred_element_type=f32)     # (1, n_sub)

        # ---- graph-side walk: y_{i+1}[cols_j] = y_i @ A[:, cols_j] -----------
        adj_t = adj_ref[...].astype(f32)                         # bf16 (exact 0/1) -> f32
        ynew = jnp.dot(y_prev[...], adj_t,
                       preferred_element_type=f32)               # (1, tile_n)
        y_buf[j] = ynew                                          # slot j of the new state

        # ---- per-tile contribution to t_i = y_{i+1} @ (one-hot / counts) -----
        tpart = jnp.dot(ynew, gnorm_ref[...],
                        preferred_element_type=f32)              # (1, n_graphs)

        @pl.when(j == 0)
        def _():
            t_acc[...] = tpart

        @pl.when(j > 0)
        def _():
            t_acc[...] += tpart

        # ---- step epilogue (last tile): place rw block, roll y state ---------
        @pl.when(j == n_tiles - 1)
        def _():
            # outer product (n_graphs, n_sub) = t^T q   (contraction over size-1 dim)
            contrib = lax.dot_general(t_acc[...], q_ref[...],
                                      (((0,), (0,)), ((), ())),
                                      preferred_element_type=f32)
            lane = lax.broadcasted_iota(jnp.int32, (n_sub, feat), 1)
            sub = lax.broadcasted_iota(jnp.int32, (n_sub, feat), 0)
            placer = (lane == i * n_sub + sub).astype(f32)
            rw_ref[...] += jnp.dot(contrib, placer, preferred_element_type=f32)
            # y_prev <- y_new (static lane slices, once per step)
            for r in range(n_tiles):
                y_prev[:, r * tile_n:(r + 1) * tile_n] = y_buf[r]

        # ---- finalize: BatchNorm (batch statistics) + 2-layer MLP -------------
        @pl.when(jnp.logical_and(i == n_steps - 1, j == n_tiles - 1))
        def _():
            rw = rw_ref[...]
            mean = jnp.mean(rw, axis=0, keepdims=True)
            var = jnp.mean((rw - mean) ** 2, axis=0, keepdims=True)
            xbn = (rw - mean) * lax.rsqrt(var + 1e-5) * gamma_ref[...] + beta_ref[...]
            h = jnp.maximum(
                jnp.dot(xbn, w1_ref[...], preferred_element_type=f32) + b1_ref[...], 0.0)
            out_ref[...] = (jnp.dot(h, w2_ref[...], preferred_element_type=f32)
                            + b2_ref[...])

    return kernel


def make_params(key, *, n_subgraphs, size_subgraph, max_step, hidden_dim, output_dim):
    n_triu = size_subgraph * (size_subgraph - 1) // 2
    feat = n_subgraphs * (max_step - 1)
    k = jax.random.split(key, 6)
    theta = jax.random.normal(k[0], (n_subgraphs, n_triu, 1), jnp.float32) * jnp.sqrt(2.0 / n_triu)
    gamma = jnp.ones((1, feat), jnp.float32)
    beta = jnp.zeros((1, feat), jnp.float32)
    b1 = 1.0 / jnp.sqrt(feat)
    w1 = jax.random.uniform(k[1], (feat, hidden_dim), jnp.float32, -b1, b1)
    bias1 = jax.random.uniform(k[2], (1, hidden_dim), jnp.float32, -b1, b1)
    b2 = 1.0 / jnp.sqrt(hidden_dim)
    w2 = jax.random.uniform(k[3], (hidden_dim, output_dim), jnp.float32, -b2, b2)
    bias2 = jax.random.uniform(k[4], (1, output_dim), jnp.float32, -b2, b2)
    return dict(theta=theta, gamma=gamma, beta=beta, w1=w1, b1=bias1, w2=w2, b2=bias2)


def rw_gnn_forward(adj, graph_indicator, params, *, n_graphs, size_subgraph,
                   max_step, normalize, output_dim):
    f32 = jnp.float32
    S = size_subgraph
    theta = params['theta']
    n_sub = theta.shape[0]
    N = adj.shape[0]
    H = params['w1'].shape[1]
    feat = n_sub * (max_step - 1)
    n_steps = max_step - 1
    nsub_s = n_sub * S

    # ---- parameter / indicator preprocessing (tiny, plain-JAX glue) ------------
    sampled = jax.nn.relu(theta)[:, :, 0]                                   # (n_sub, n_triu)
    iu, ju = jnp.triu_indices(S, k=1)
    adj_sampled = jnp.zeros((n_sub, S, S), f32).at[:, iu, ju].set(sampled)
    adj_sampled = adj_sampled + jnp.swapaxes(adj_sampled, 1, 2)             # symmetric

    # block-diagonal (n_sub*S, n_sub*S) sampled adjacency, its row sums, and the
    # per-subgraph sum selector
    eye4 = jnp.eye(n_sub, dtype=f32)[:, None, :, None]
    bd = (eye4 * adj_sampled[:, :, None, :]).reshape(nsub_s, nsub_s)
    bd_rowsum = jnp.sum(bd, axis=1).reshape(1, nsub_s)                      # Asub @ 1
    selt = jnp.kron(jnp.eye(n_sub, dtype=f32), jnp.ones((S, 1), f32))       # (n_sub*S, n_sub)

    # TODO(synk): torch.unique is replaced by assuming contiguous, non-empty
    # graph ids 0..n_graphs-1 (an empty graph would make the folded 1/counts inf).
    gtt = jax.nn.one_hot(graph_indicator, n_graphs, dtype=f32)              # (N, n_graphs)
    if normalize:
        gtt = gtt / jnp.sum(gtt, axis=0)[None, :]      # fold 1/|V_g| in, hoisted

    # ---- per-generation tile / VMEM budget --------------------------------------
    try:
        vmem_cap = int(pltpu.get_tpu_info().vmem_capacity_bytes)
    except Exception:
        vmem_cap = 64 * 2 ** 20                        # conservative (v7x per-core)

    small_shapes = [(nsub_s, nsub_s), (1, nsub_s), (nsub_s, n_sub),
                    (1, feat), (1, feat), (feat, H), (1, H),
                    (H, output_dim), (1, output_dim)]
    fixed = (sum(2 * _padded_bytes(s, f32) for s in small_shapes)   # resident consts (x2 buf)
             + _padded_bytes((1, N), f32)                           # y_prev
             + _padded_bytes((1, n_graphs), f32)                    # t accumulator
             + _padded_bytes((1, nsub_s), f32) + _padded_bytes((1, n_sub), f32)
             + _padded_bytes((n_graphs, feat), f32)                 # rw features
             + 2 * _padded_bytes((n_graphs, output_dim), f32))      # out block

    def full_cost(t):
        return (2 * _padded_bytes((N, t), jnp.bfloat16)             # double-buffered adj tile
                + _padded_bytes((N, t), f32)                        # in-kernel f32 cast temp
                + 2 * _padded_bytes((t, n_graphs), f32)             # indicator tile
                + (N // t) * _padded_bytes((1, t), f32)             # y_new slots
                + fixed)

    budget = int(0.45 * vmem_cap)
    cands = [N] + [t for t in (4096, 2048, 1024, 512, 256, 128) if t < N and N % t == 0]
    tile_n = None
    for t in cands:                                    # largest first
        if full_cost(t) <= budget:
            tile_n = t
            break
    if tile_n is None:
        # TODO(synk): N neither small enough to keep resident nor divisible by 128.
        tile_n = cands[-1]
    n_tiles = N // tile_n

    est = full_cost(tile_n)
    vmem_limit = int(min(0.9 * vmem_cap, max(16 * 2 ** 20, 1.5 * est + (4 << 20))))

    # Advisory cost estimate for the XLA scheduler.
    adj_stream = N * N * 2 * (1 if n_tiles == 1 else n_steps)
    flops = int(n_steps * (2 * N * N + 2 * N * n_graphs
                           + 2 * nsub_s * nsub_s + 2 * nsub_s * n_sub
                           + 2 * n_graphs * n_sub * (1 + feat))
                + 2 * n_graphs * feat * H + 2 * n_graphs * H * output_dim)
    bytes_accessed = int(adj_stream
                         + 4 * N * n_graphs * (1 if n_tiles == 1 else n_steps)
                         + 4 * (nsub_s * nsub_s + nsub_s + nsub_s * n_sub
                                + 2 * feat + feat * H + H + H * output_dim
                                + output_dim + n_graphs * output_dim))
    cost = pl.CostEstimate(flops=flops, transcendentals=int(feat),
                           bytes_accessed=bytes_accessed)

    kernel = _make_kernel(n_steps=n_steps, n_tiles=n_tiles, tile_n=tile_n,
                          n_sub=n_sub, feat=feat)

    def const(shape):
        return pl.BlockSpec(shape, lambda i, j: (0, 0))

    out = pl.pallas_call(
        kernel,
        out_shape=jax.ShapeDtypeStruct((n_graphs, output_dim), f32),
        grid=(n_steps, n_tiles),
        in_specs=[
            pl.BlockSpec((N, tile_n), lambda i, j: (0, j)),        # adj column tile (bf16)
            pl.BlockSpec((tile_n, n_graphs), lambda i, j: (j, 0)), # indicator rows of tile
            const((nsub_s, nsub_s)),                               # block-diag sampled adj
            const((1, nsub_s)),                                    # its row sums (Asub @ 1)
            const((nsub_s, n_sub)),                                # per-subgraph sum selector
            const((1, feat)), const((1, feat)),                    # bn gamma / beta
            const((feat, H)), const((1, H)),                       # layer_1 W, b
            const((H, output_dim)), const((1, output_dim)),        # layer_2 W, b
        ],
        out_specs=pl.BlockSpec((n_graphs, output_dim), lambda i, j: (0, 0)),
        scratch_shapes=[
            pltpu.VMEM((1, N), f32),                  # y_prev = 1^T A^i (lane-dense)
            pltpu.VMEM((n_tiles, 1, tile_n), f32),    # y_new, one slot per column tile
            pltpu.VMEM((1, n_graphs), f32),           # t accumulator
            pltpu.VMEM((1, nsub_s), f32),             # subgraph walk state
            pltpu.VMEM((1, n_sub), f32),              # per-step subgraph sums
            pltpu.VMEM((n_graphs, feat), f32),        # random-walk features
        ],
        compiler_params=pltpu.CompilerParams(
            dimension_semantics=("arbitrary", "arbitrary"),
            vmem_limit_bytes=vmem_limit),
        cost_estimate=cost,
    )(adj.astype(jnp.bfloat16), gtt, bd, bd_rowsum, selt,
      params['gamma'], params['beta'], params['w1'], params['b1'],
      params['w2'], params['b2'])
    return out


def rw_gnn_reference(adj, graph_indicator, params, *, n_graphs, size_subgraph,
                     max_step, normalize):
    """Pure-JAX mirror of the PyTorch forward, for verification."""
    S = size_subgraph
    theta = params['theta']
    n_sub = theta.shape[0]
    N = adj.shape[0]
    sampled = jax.nn.relu(theta)[:, :, 0]
    iu, ju = jnp.triu_indices(S, k=1)
    adj_sampled = jnp.zeros((n_sub, S, S), jnp.float32).at[:, iu, ju].set(sampled)
    adj_sampled = adj_sampled + jnp.swapaxes(adj_sampled, 1, 2)
    one_hot = jax.nn.one_hot(graph_indicator, n_graphs, dtype=jnp.float32)   # (N, n_graphs)
    counts = jnp.sum(one_hot, axis=0)
    norm = jnp.broadcast_to(counts[:, None], (n_graphs, n_sub))
    E = jnp.ones((n_sub, S, N), jnp.float32)
    I = jnp.eye(N, dtype=jnp.float32)
    P = E
    outs = []
    for _ in range(1, max_step):
        I = adj @ I
        P = jnp.einsum('abc,acd->abd', adj_sampled, P)
        res = jnp.einsum('abc,cd->abd', P, I)
        res = jnp.einsum('abn,ng->abg', res, one_hot)    # index_add_ over nodes
        res = jnp.sum(res, axis=1).T                     # (n_graphs, n_sub)
        if normalize:
            res = res / norm
        outs.append(res)
    rw = jnp.concatenate(outs, axis=1)
    mean = jnp.mean(rw, axis=0, keepdims=True)
    var = jnp.mean((rw - mean) ** 2, axis=0, keepdims=True)
    xbn = (rw - mean) / jnp.sqrt(var + 1e-5) * params['gamma'] + params['beta']
    h = jax.nn.relu(xbn @ params['w1'] + params['b1'])
    return h @ params['w2'] + params['b2']


if __name__ == "__main__":
    # small config consistent with the module
    hidden_dim, output_dim = 32, 8
    n_subgraphs, size_subgraph = 4, 8
    max_step, normalize = 3, True
    N, n_graphs = 16, 2

    key = jax.random.PRNGKey(0)
    k_adj, k_params = jax.random.split(key)

    # symmetric 0/1 adjacency with zero diagonal
    m = jax.random.bernoulli(k_adj, 0.3, (N, N)).astype(jnp.float32)
    adj = ((m + m.T) > 0).astype(jnp.float32)
    adj = adj * (1.0 - jnp.eye(N, dtype=jnp.float32))

    graph_indicator = jnp.array([0] * 9 + [1] * 7, dtype=jnp.int32)

    params = make_params(k_params, n_subgraphs=n_subgraphs, size_subgraph=size_subgraph,
                         max_step=max_step, hidden_dim=hidden_dim, output_dim=output_dim)

    out = rw_gnn_forward(adj, graph_indicator, params,
                         n_graphs=n_graphs, size_subgraph=size_subgraph,
                         max_step=max_step, normalize=normalize, output_dim=output_dim)
    out = jax.block_until_ready(out)

    ref = rw_gnn_reference(adj, graph_indicator, params,
                           n_graphs=n_graphs, size_subgraph=size_subgraph,
                           max_step=max_step, normalize=normalize)
    assert out.shape == (n_graphs, output_dim)
    assert jnp.allclose(out, ref, atol=1e-3, rtol=1e-3)
    print("KERNEL_OK")
</pallas_src>

<mosaic_0001>
module attributes {stable_mosaic.version = 11 : i64} {
  func.func @kernel(%arg0: i32, %arg1: i32, %arg2: memref<16x16xbf16, #tpu.memory_space<vmem>>, %arg3: memref<16x2xf32, #tpu.memory_space<vmem>>, %arg4: memref<32x32xf32, #tpu.memory_space<vmem>>, %arg5: memref<1x32xf32, #tpu.memory_space<vmem>>, %arg6: memref<32x4xf32, #tpu.memory_space<vmem>>, %arg7: memref<1x8xf32, #tpu.memory_space<vmem>>, %arg8: memref<1x8xf32, #tpu.memory_space<vmem>>, %arg9: memref<8x32xf32, #tpu.memory_space<vmem>>, %arg10: memref<1x32xf32, #tpu.memory_space<vmem>>, %arg11: memref<32x8xf32, #tpu.memory_space<vmem>>, %arg12: memref<1x8xf32, #tpu.memory_space<vmem>>, %arg13: memref<2x8xf32, #tpu.memory_space<vmem>>, %arg14: memref<1x16xf32, #tpu.memory_space<vmem>>, %arg15: memref<1x1x16xf32, #tpu.memory_space<vmem>>, %arg16: memref<1x2xf32, #tpu.memory_space<vmem>>, %arg17: memref<1x32xf32, #tpu.memory_space<vmem>>, %arg18: memref<1x4xf32, #tpu.memory_space<vmem>>, %arg19: memref<2x8xf32, #tpu.memory_space<vmem>>) attributes {dimension_semantics = [#tpu.dimension_semantics<arbitrary>, #tpu.dimension_semantics<arbitrary>], iteration_bounds = array<i64: 2, 1>, scalar_prefetch = 0 : i64, scratch_operands = 6 : i64, tpu.core_type = #tpu.core_type<tc>, window_params = [{transform_indices = @transform_0, window_bounds = array<i64: 16, 16>}, {transform_indices = @transform_1, window_bounds = array<i64: 16, 2>}, {pipeline_mode = #tpu.pipeline_mode<synchronous>, transform_indices = @transform_2, window_bounds = array<i64: 32, 32>}, {pipeline_mode = #tpu.pipeline_mode<synchronous>, transform_indices = @transform_3, window_bounds = array<i64: 1, 32>}, {pipeline_mode = #tpu.pipeline_mode<synchronous>, transform_indices = @transform_4, window_bounds = array<i64: 32, 4>}, {pipeline_mode = #tpu.pipeline_mode<synchronous>, transform_indices = @transform_5, window_bounds = array<i64: 1, 8>}, {pipeline_mode = #tpu.pipeline_mode<synchronous>, transform_indices = @transform_6, window_bounds = array<i64: 1, 8>}, {pipeline_mode = #tpu.pipeline_mode<synchronous>, transform_indices = @transform_7, window_bounds = array<i64: 8, 32>}, {pipeline_mode = #tpu.pipeline_mode<synchronous>, transform_indices = @transform_8, window_bounds = array<i64: 1, 32>}, {pipeline_mode = #tpu.pipeline_mode<synchronous>, transform_indices = @transform_9, window_bounds = array<i64: 32, 8>}, {pipeline_mode = #tpu.pipeline_mode<synchronous>, transform_indices = @transform_10, window_bounds = array<i64: 1, 8>}, {pipeline_mode = #tpu.pipeline_mode<synchronous>, transform_indices = @transform_11, window_bounds = array<i64: 2, 8>}]} {
    %c0_i32 = arith.constant 0 : i32
    %0 = arith.cmpi eq, %arg0, %c0_i32 : i32
    %c0_i32_0 = arith.constant 0 : i32
    %1 = arith.cmpi eq, %arg1, %c0_i32_0 : i32
    %2 = arith.andi %0, %1 : i1
    %3 = arith.extui %2 : i1 to i32
    %c0_i32_1 = arith.constant 0 : i32
    %4 = arith.cmpi ne, %3, %c0_i32_1 : i32
    scf.if %4 {
      %cst_26 = arith.constant 1.000000e+00 : f32
      %42 = vector.broadcast %cst_26 : f32 to vector<1x16xf32>
      %c0_27 = arith.constant 0 : index
      %c0_28 = arith.constant 0 : index
      %43 = vector.load %arg14[%c0_27, %c0_28] : memref<1x16xf32, #tpu.memory_space<vmem>>, vector<1x16xf32>
      tpu.vector_store %arg14[%c0_27, %c0_28], %42 {strides = array<i32>} : memref<1x16xf32, #tpu.memory_space<vmem>>, vector<1x16xf32>,
      %cst_29 = arith.constant 0.000000e+00 : f32
      %44 = vector.broadcast %cst_29 : f32 to vector<2x8xf32>
      %c0_30 = arith.constant 0 : index
      %c0_31 = arith.constant 0 : index
      %45 = vector.load %arg19[%c0_30, %c0_31] : memref<2x8xf32, #tpu.memory_space<vmem>>, vector<2x8xf32>
      tpu.vector_store %arg19[%c0_30, %c0_31], %44 {strides = array<i32>} : memref<2x8xf32, #tpu.memory_space<vmem>>, vector<2x8xf32>,
    } else {
    }
    %c0_i32_2 = arith.constant 0 : i32
    %5 = arith.cmpi eq, %arg1, %c0_i32_2 : i32
    %c0_i32_3 = arith.constant 0 : i32
    %6 = arith.cmpi eq, %arg0, %c0_i32_3 : i32
    %7 = arith.andi %5, %6 : i1
    %8 = arith.extui %7 : i1 to i32
    %c0_i32_4 = arith.constant 0 : i32
    %9 = arith.cmpi ne, %8, %c0_i32_4 : i32
    scf.if %9 {
      %c0_26 = arith.constant 0 : index
      %c0_27 = arith.constant 0 : index
      %42 = vector.load %arg5[%c0_26, %c0_27] : memref<1x32xf32, #tpu.memory_space<vmem>>, vector<1x32xf32>
      %c0_28 = arith.constant 0 : index
      %c0_29 = arith.constant 0 : index
      %43 = vector.load %arg17[%c0_28, %c0_29] : memref<1x32xf32, #tpu.memory_space<vmem>>, vector<1x32xf32>
      tpu.vector_store %arg17[%c0_28, %c0_29], %42 {strides = array<i32>} : memref<1x32xf32, #tpu.memory_space<vmem>>, vector<1x32xf32>,
    } else {
    }
    %c0_i32_5 = arith.constant 0 : i32
    %10 = arith.cmpi eq, %arg1, %c0_i32_5 : i32
    %c0_i32_6 = arith.constant 0 : i32
    %11 = arith.cmpi sgt, %arg0, %c0_i32_6 : i32
    %12 = arith.andi %10, %11 : i1
    %13 = arith.extui %12 : i1 to i32
    %c0_i32_7 = arith.constant 0 : i32
    %14 = arith.cmpi ne, %13, %c0_i32_7 : i32
    scf.if %14 {
      %c0_26 = arith.constant 0 : index
      %c0_27 = arith.constant 0 : index
      %42 = vector.load %arg17[%c0_26, %c0_27] : memref<1x32xf32, #tpu.memory_space<vmem>>, vector<1x32xf32>
      %c0_28 = arith.constant 0 : index
      %c0_29 = arith.constant 0 : index
      %43 = vector.load %arg4[%c0_28, %c0_29] : memref<32x32xf32, #tpu.memory_space<vmem>>, vector<32x32xf32>
      %cst_30 = arith.constant dense<0.000000e+00> : vector<1x32xf32>
      %44 = tpu.matmul %42, %43, %cst_30 {dimension_numbers = #tpu.dot_dimension_numbers<[1], [0], [0], [1], [0, 0, 1, 1], [], []>} : vector<1x32xf32>, vector<32x32xf32>, vector<1x32xf32> -> vector<1x32xf32>
      %c0_31 = arith.constant 0 : index
      %c0_32 = arith.constant 0 : index
      %45 = vector.load %arg17[%c0_31, %c0_32] : memref<1x32xf32, #tpu.memory_space<vmem>>, vector<1x32xf32>
      tpu.vector_store %arg17[%c0_31, %c0_32], %44 {strides = array<i32>} : memref<1x32xf32, #tpu.memory_space<vmem>>, vector<1x32xf32>,
    } else {
    }
    %c0_i32_8 = arith.constant 0 : i32
    %15 = arith.cmpi eq, %arg1, %c0_i32_8 : i32
    %16 = arith.extui %15 : i1 to i32
    %c0_i32_9 = arith.constant 0 : i32
    %17 = arith.cmpi ne, %16, %c0_i32_9 : i32
    scf.if %17 {
      %c0_26 = arith.constant 0 : index
      %c0_27 = arith.constant 0 : index
      %42 = vector.load %arg17[%c0_26, %c0_27] : memref<1x32xf32, #tpu.memory_space<vmem>>, vector<1x32xf32>
      %c0_28 = arith.constant 0 : index
      %c0_29 = arith.constant 0 : index
      %43 = vector.load %arg6[%c0_28, %c0_29] : memref<32x4xf32, #tpu.memory_space<vmem>>, vector<32x4xf32>
      %cst_30 = arith.constant dense<0.000000e+00> : vector<1x4xf32>
      %44 = tpu.matmul %42, %43, %cst_30 {dimension_numbers = #tpu.dot_dimension_numbers<[1], [0], [0], [1], [0, 0, 1, 1], [], []>} : vector<1x32xf32>, vector<32x4xf32>, vector<1x4xf32> -> vector<1x4xf32>
      %c0_31 = arith.constant 0 : index
      %c0_32 = arith.constant 0 : index
      %45 = vector.load %arg18[%c0_31, %c0_32] : memref<1x4xf32, #tpu.memory_space<vmem>>, vector<1x4xf32>
      tpu.vector_store %arg18[%c0_31, %c0_32], %44 {strides = array<i32>} : memref<1x4xf32, #tpu.memory_space<vmem>>, vector<1x4xf32>,
    } else {
    }
    %c0 = arith.constant 0 : index
    %c0_10 = arith.constant 0 : index
    %18 = vector.load %arg2[%c0, %c0_10] : memref<16x16xbf16, #tpu.memory_space<vmem>>, vector<16x16xbf16>
    %19 = arith.extf %18 : vector<16x16xbf16> to vector<16x16xf32>
    %c0_11 = arith.constant 0 : index
    %c0_12 = arith.constant 0 : index
    %20 = vector.load %arg14[%c0_11, %c0_12] : memref<1x16xf32, #tpu.memory_space<vmem>>, vector<1x16xf32>
    %cst = arith.constant dense<0.000000e+00> : vector<1x16xf32>
    %21 = tpu.matmul %20, %19, %cst {dimension_numbers = #tpu.dot_dimension_numbers<[1], [0], [0], [1], [0, 0, 1, 1], [], []>} : vector<1x16xf32>, vector<16x16xf32>, vector<1x16xf32> -> vector<1x16xf32>
    %22 = arith.index_cast %arg1 : i32 to index
    %c0_13 = arith.constant 0 : index
    %c0_14 = arith.constant 0 : index
    %23 = vector.load %arg15[%22, %c0_13, %c0_14] : memref<1x1x16xf32, #tpu.memory_space<vmem>>, vector<1x1x16xf32>
    %24 = vector.shape_cast %23 : vector<1x1x16xf32> to vector<1x16xf32>
    %25 = vector.shape_cast %21 : vector<1x16xf32> to vector<1x1x16xf32>
    tpu.vector_store %arg15[%22, %c0_13, %c0_14], %25 {strides = array<i32>} : memref<1x1x16xf32, #tpu.memory_space<vmem>>, vector<1x1x16xf32>,
    %c0_15 = arith.constant 0 : index
    %c0_16 = arith.constant 0 : index
    %26 = vector.load %arg3[%c0_15, %c0_16] : memref<16x2xf32, #tpu.memory_space<vmem>>, vector<16x2xf32>
    %cst_17 = arith.constant dense<0.000000e+00> : vector<1x2xf32>
    %27 = tpu.matmul %21, %26, %cst_17 {dimension_numbers = #tpu.dot_dimension_numbers<[1], [0], [0], [1], [0, 0, 1, 1], [], []>} : vector<1x16xf32>, vector<16x2xf32>, vector<1x2xf32> -> vector<1x2xf32>
    %c0_i32_18 = arith.constant 0 : i32
    %28 = arith.cmpi eq, %arg1, %c0_i32_18 : i32
    %29 = arith.extui %28 : i1 to i32
    %c0_i32_19 = arith.constant 0 : i32
    %30 = arith.cmpi ne, %29, %c0_i32_19 : i32
    scf.if %30 {
      %c0_26 = arith.constant 0 : index
      %c0_27 = arith.constant 0 : index
      %42 = vector.load %arg16[%c0_26, %c0_27] : memref<1x2xf32, #tpu.memory_space<vmem>>, vector<1x2xf32>
      tpu.vector_store %arg16[%c0_26, %c0_27], %27 {strides = array<i32>} : memref<1x2xf32, #tpu.memory_space<vmem>>, vector<1x2xf32>,
    } else {
    }
    %c0_i32_20 = arith.constant 0 : i32
    %31 = arith.cmpi sgt, %arg1, %c0_i32_20 : i32
    %32 = arith.extui %31 : i1 to i32
    %c0_i32_21 = arith.constant 0 : i32
    %33 = arith.cmpi ne, %32, %c0_i32_21 : i32
    scf.if %33 {
      %c0_26 = arith.constant 0 : index
      %c0_27 = arith.constant 0 : index
      %42 = vector.load %arg16[%c0_26, %c0_27] : memref<1x2xf32, #tpu.memory_space<vmem>>, vector<1x2xf32>
      %43 = arith.addf %42, %27 : vector<1x2xf32>
      %c0_28 = arith.constant 0 : index
      %c0_29 = arith.constant 0 : index
      %44 = vector.load %arg16[%c0_28, %c0_29] : memref<1x2xf32, #tpu.memory_space<vmem>>, vector<1x2xf32>
      tpu.vector_store %arg16[%c0_28, %c0_29], %43 {strides = array<i32>} : memref<1x2xf32, #tpu.memory_space<vmem>>, vector<1x2xf32>,
    } else {
    }
    %c0_i32_22 = arith.constant 0 : i32
    %34 = arith.cmpi eq, %arg1, %c0_i32_22 : i32
    %35 = arith.extui %34 : i1 to i32
    %c0_i32_23 = arith.constant 0 : i32
    %36 = arith.cmpi ne, %35, %c0_i32_23 : i32
    scf.if %36 {
      %c0_26 = arith.constant 0 : index
      %c0_27 = arith.constant 0 : index
      %42 = vector.load %arg16[%c0_26, %c0_27] : memref<1x2xf32, #tpu.memory_space<vmem>>, vector<1x2xf32>
      %c0_28 = arith.constant 0 : index
      %c0_29 = arith.constant 0 : index
      %43 = vector.load %arg18[%c0_28, %c0_29] : memref<1x4xf32, #tpu.memory_space<vmem>>, vector<1x4xf32>
      %cst_30 = arith.constant dense<0.000000e+00> : vector<2x4xf32>
      %44 = tpu.matmul %42, %43, %cst_30 {dimension_numbers = #tpu.dot_dimension_numbers<[0], [0], [1], [1], [0, 1, 1, 1], [], []>} : vector<1x2xf32>, vector<1x4xf32>, vector<2x4xf32> -> vector<2x4xf32>
      %45 = tpu.iota {dimensions = array<i32: 1>} : vector<4x8xi32>
      %46 = tpu.iota {dimensions = array<i32: 0>} : vector<4x8xi32>
      %c4_i32 = arith.constant 4 : i32
      %47 = arith.muli %arg0, %c4_i32 : i32
      %48 = vector.broadcast %47 : i32 to vector<4x8xi32>
      %49 = arith.addi %48, %46 : vector<4x8xi32>
      %50 = arith.cmpi eq, %45, %49 : vector<4x8xi32>
      %51 = arith.extui %50 : vector<4x8xi1> to vector<4x8xi32>
      %52 = arith.sitofp %51 : vector<4x8xi32> to vector<4x8xf32>
      %c0_31 = arith.constant 0 : index
      %c0_32 = arith.constant 0 : index
      %53 = vector.load %arg19[%c0_31, %c0_32] : memref<2x8xf32, #tpu.memory_space<vmem>>, vector<2x8xf32>
      %cst_33 = arith.constant dense<0.000000e+00> : vector<2x8xf32>
      %54 = tpu.matmul %44, %52, %cst_33 {dimension_numbers = #tpu.dot_dimension_numbers<[1], [0], [0], [1], [0, 0, 1, 1], [], []>} : vector<2x4xf32>, vector<4x8xf32>, vector<2x8xf32> -> vector<2x8xf32>
      %55 = arith.addf %53, %54 : vector<2x8xf32>
      %c0_34 = arith.constant 0 : index
      %c0_35 = arith.constant 0 : index
      %56 = vector.load %arg19[%c0_34, %c0_35] : memref<2x8xf32, #tpu.memory_space<vmem>>, vector<2x8xf32>
      tpu.vector_store %arg19[%c0_34, %c0_35], %55 {strides = array<i32>} : memref<2x8xf32, #tpu.memory_space<vmem>>, vector<2x8xf32>,
      %c0_36 = arith.constant 0 : index
      %c0_37 = arith.constant 0 : index
      %c0_38 = arith.constant 0 : index
      %57 = vector.load %arg15[%c0_36, %c0_37, %c0_38] : memref<1x1x16xf32, #tpu.memory_space<vmem>>, vector<1x1x16xf32>
      %58 = vector.shape_cast %57 : vector<1x1x16xf32> to vector<1x16xf32>
      %c0_39 = arith.constant 0 : index
      %c0_40 = arith.constant 0 : index
      %59 = vector.load %arg14[%c0_39, %c0_40] : memref<1x16xf32, #tpu.memory_space<vmem>>, vector<1x16xf32>
      tpu.vector_store %arg14[%c0_39, %c0_40], %58 {strides = array<i32>} : memref<1x16xf32, #tpu.memory_space<vmem>>, vector<1x16xf32>,
    } else {
    }
    %c1_i32 = arith.constant 1 : i32
    %37 = arith.cmpi eq, %arg0, %c1_i32 : i32
    %c0_i32_24 = arith.constant 0 : i32
    %38 = arith.cmpi eq, %arg1, %c0_i32_24 : i32
    %39 = arith.andi %37, %38 : i1
    %40 = arith.extui %39 : i1 to i32
    %c0_i32_25 = arith.constant 0 : i32
    %41 = arith.cmpi ne, %40, %c0_i32_25 : i32
    scf.if %41 {
      %c0_26 = arith.constant 0 : index
      %c0_27 = arith.constant 0 : index
      %42 = vector.load %arg19[%c0_26, %c0_27] : memref<2x8xf32, #tpu.memory_space<vmem>>, vector<2x8xf32>
      %cst_28 = arith.constant dense<0.000000e+00> : vector<8xf32>
      %43 = vector.multi_reduction <add>, %42, %cst_28 [0] : vector<2x8xf32> to vector<8xf32>
      %44 = vector.shape_cast %43 : vector<8xf32> to vector<1x8xf32>
      %cst_29 = arith.constant 2.000000e+00 : f32
      %45 = vector.broadcast %cst_29 : f32 to vector<1x8xf32>
      %46 = arith.divf %44, %45 : vector<1x8xf32>
      %47 = vector.broadcast %46 : vector<1x8xf32> to vector<2x8xf32>
      %48 = arith.subf %42, %47 : vector<2x8xf32>
      %49 = arith.mulf %48, %48 : vector<2x8xf32>
      %cst_30 = arith.constant dense<0.000000e+00> : vector<8xf32>
      %50 = vector.multi_reduction <add>, %49, %cst_30 [0] : vector<2x8xf32> to vector<8xf32>
      %51 = vector.shape_cast %50 : vector<8xf32> to vector<1x8xf32>
      %cst_31 = arith.constant 2.000000e+00 : f32
      %52 = vector.broadcast %cst_31 : f32 to vector<1x8xf32>
      %53 = arith.divf %51, %52 : vector<1x8xf32>
      %54 = vector.broadcast %46 : vector<1x8xf32> to vector<2x8xf32>
      %55 = arith.subf %42, %54 : vector<2x8xf32>
      %cst_32 = arith.constant 9.99999974E-6 : f32
      %56 = vector.broadcast %cst_32 : f32 to vector<1x8xf32>
      %57 = arith.addf %53, %56 : vector<1x8xf32>
      %58 = math.rsqrt %57 : vector<1x8xf32>
      %59 = vector.broadcast %58 : vector<1x8xf32> to vector<2x8xf32>
      %60 = arith.mulf %55, %59 : vector<2x8xf32>
      %c0_33 = arith.constant 0 : index
      %c0_34 = arith.constant 0 : index
      %61 = vector.load %arg7[%c0_33, %c0_34] : memref<1x8xf32, #tpu.memory_space<vmem>>, vector<1x8xf32>
      %62 = vector.broadcast %61 : vector<1x8xf32> to vector<2x8xf32>
      %63 = arith.mulf %60, %62 : vector<2x8xf32>
      %c0_35 = arith.constant 0 : index
      %c0_36 = arith.constant 0 : index
      %64 = vector.load %arg8[%c0_35, %c0_36] : memref<1x8xf32, #tpu.memory_space<vmem>>, vector<1x8xf32>
      %65 = vector.broadcast %64 : vector<1x8xf32> to vector<2x8xf32>
      %66 = arith.addf %63, %65 : vector<2x8xf32>
      %c0_37 = arith.constant 0 : index
      %c0_38 = arith.constant 0 : index
      %67 = vector.load %arg9[%c0_37, %c0_38] : memref<8x32xf32, #tpu.memory_space<vmem>>, vector<8x32xf32>
      %cst_39 = arith.constant dense<0.000000e+00> : vector<2x32xf32>
      %68 = tpu.matmul %66, %67, %cst_39 {dimension_numbers = #tpu.dot_dimension_numbers<[1], [0], [0], [1], [0, 0, 1, 1], [], []>} : vector<2x8xf32>, vector<8x32xf32>, vector<2x32xf32> -> vector<2x32xf32>
      %c0_40 = arith.constant 0 : index
      %c0_41 = arith.constant 0 : index
      %69 = vector.load %arg10[%c0_40, %c0_41] : memref<1x32xf32, #tpu.memory_space<vmem>>, vector<1x32xf32>
      %70 = vector.broadcast %69 : vector<1x32xf32> to vector<2x32xf32>
      %71 = arith.addf %68, %70 : vector<2x32xf32>
      %cst_42 = arith.constant 0.000000e+00 : f32
      %72 = vector.broadcast %cst_42 : f32 to vector<2x32xf32>
      %73 = arith.maximumf %71, %72 : vector<2x32xf32>
      %c0_43 = arith.constant 0 : index
      %c0_44 = arith.constant 0 : index
      %74 = vector.load %arg11[%c0_43, %c0_44] : memref<32x8xf32, #tpu.memory_space<vmem>>, vector<32x8xf32>
      %cst_45 = arith.constant dense<0.000000e+00> : vector<2x8xf32>
      %75 = tpu.matmul %73, %74, %cst_45 {dimension_numbers = #tpu.dot_dimension_numbers<[1], [0], [0], [1], [0, 0, 1, 1], [], []>} : vector<2x32xf32>, vector<32x8xf32>, vector<2x8xf32> -> vector<2x8xf32>
      %c0_46 = arith.constant 0 : index
      %c0_47 = arith.constant 0 : index
      %76 = vector.load %arg12[%c0_46, %c0_47] : memref<1x8xf32, #tpu.memory_space<vmem>>, vector<1x8xf32>
      %77 = vector.broadcast %76 : vector<1x8xf32> to vector<2x8xf32>
      %78 = arith.addf %75, %77 : vector<2x8xf32>
      %c0_48 = arith.constant 0 : index
      %c0_49 = arith.constant 0 : index
      %79 = vector.load %arg13[%c0_48, %c0_49] : memref<2x8xf32, #tpu.memory_space<vmem>>, vector<2x8xf32>
      tpu.vector_store %arg13[%c0_48, %c0_49], %78 {strides = array<i32>} : memref<2x8xf32, #tpu.memory_space<vmem>>, vector<2x8xf32>,
    } else {
    }
    return
  }
  func.func @transform_0(%arg0: i32, %arg1: i32) -> (i32, i32) {
    %c0_i32 = arith.constant 0 : i32
    %c0_i32_0 = arith.constant 0 : i32
    return %c0_i32, %arg1 : i32, i32
  }
  func.func @transform_1(%arg0: i32, %arg1: i32) -> (i32, i32) {
    %c0_i32 = arith.constant 0 : i32
    %c0_i32_0 = arith.constant 0 : i32
    return %arg1, %c0_i32 : i32, i32
  }
  func.func @transform_2(%arg0: i32, %arg1: i32) -> (i32, i32) {
    %c0_i32 = arith.constant 0 : i32
    %c0_i32_0 = arith.constant 0 : i32
    %c0_i32_1 = arith.constant 0 : i32
    return %c0_i32, %c0_i32_0 : i32, i32
  }
  func.func @transform_3(%arg0: i32, %arg1: i32) -> (i32, i32) {
    %c0_i32 = arith.constant 0 : i32
    %c0_i32_0 = arith.constant 0 : i32
    %c0_i32_1 = arith.constant 0 : i32
    return %c0_i32, %c0_i32_0 : i32, i32
  }
  func.func @transform_4(%arg0: i32, %arg1: i32) -> (i32, i32) {
    %c0_i32 = arith.constant 0 : i32
    %c0_i32_0 = arith.constant 0 : i32
    %c0_i32_1 = arith.constant 0 : i32
    return %c0_i32, %c0_i32_0 : i32, i32
  }
  func.func @transform_5(%arg0: i32, %arg1: i32) -> (i32, i32) {
    %c0_i32 = arith.constant 0 : i32
    %c0_i32_0 = arith.constant 0 : i32
    %c0_i32_1 = arith.constant 0 : i32
    return %c0_i32, %c0_i32_0 : i32, i32
  }
  func.func @transform_6(%arg0: i32, %arg1: i32) -> (i32, i32) {
    %c0_i32 = arith.constant 0 : i32
    %c0_i32_0 = arith.constant 0 : i32
    %c0_i32_1 = arith.constant 0 : i32
    return %c0_i32, %c0_i32_0 : i32, i32
  }
  func.func @transform_7(%arg0: i32, %arg1: i32) -> (i32, i32) {
    %c0_i32 = arith.constant 0 : i32
    %c0_i32_0 = arith.constant 0 : i32
    %c0_i32_1 = arith.constant 0 : i32
    return %c0_i32, %c0_i32_0 : i32, i32
  }
  func.func @transform_8(%arg0: i32, %arg1: i32) -> (i32, i32) {
    %c0_i32 = arith.constant 0 : i32
    %c0_i32_0 = arith.constant 0 : i32
    %c0_i32_1 = arith.constant 0 : i32
    return %c0_i32, %c0_i32_0 : i32, i32
  }
  func.func @transform_9(%arg0: i32, %arg1: i32) -> (i32, i32) {
    %c0_i32 = arith.constant 0 : i32
    %c0_i32_0 = arith.constant 0 : i32
    %c0_i32_1 = arith.constant 0 : i32
    return %c0_i32, %c0_i32_0 : i32, i32
  }
  func.func @transform_10(%arg0: i32, %arg1: i32) -> (i32, i32) {
    %c0_i32 = arith.constant 0 : i32
    %c0_i32_0 = arith.constant 0 : i32
    %c0_i32_1 = arith.constant 0 : i32
    return %c0_i32, %c0_i32_0 : i32, i32
  }
  func.func @transform_11(%arg0: i32, %arg1: i32) -> (i32, i32) {
    %c0_i32 = arith.constant 0 : i32
    %c0_i32_0 = arith.constant 0 : i32
    %c0_i32_1 = arith.constant 0 : i32
    return %c0_i32, %c0_i32_0 : i32, i32
  }
}

</mosaic_0001>

<bundles_post_ra>
// kernel: tpu_custom_call.1
= control target key start
LH: loop header
LB: loop body
LE: loop exit
PB: predicated region body
PF: predicated region fallthrough
CT: control target
= control target key end

     0   :  { %16 = vsyncpa [#allocation9], 0  ;;  %s1540_s17 = smov 0   ;;  %s1542_s18 = smov 0   ;;  %s1683_s0 = inlined_call_operand.vmem [shape: bf16[16,16], index: 0, kind: input, shape index: {}]   ;;  %s1684_s1 = inlined_call_operand.vmem [shape: f32[16,2], index: 1, kind: input, shape index: {}]   ;;  %s1685_s2 = inlined_call_operand.vmem [shape: f32[32,32], index: 2, kind: input, shape index: {}]   ;;  %s1686_s3 = inlined_call_operand.vmem [shape: f32[1,32], index: 3, kind: input, shape index: {}]   ;;  %s1687_s4 = inlined_call_operand.vmem [shape: f32[32,4], index: 4, kind: input, shape index: {}]   ;;  %s1688_s5 = inlined_call_operand.vmem [shape: f32[1,8], index: 5, kind: input, shape index: {}]   ;;  %s1689_s6 = inlined_call_operand.vmem [shape: f32[1,8], index: 6, kind: input, shape index: {}]   ;;  %s1690_s7 = inlined_call_operand.vmem [shape: f32[8,32], index: 7, kind: input, shape index: {}]   ;;  %s1691_s8 = inlined_call_operand.vmem [shape: f32[1,32], index: 8, kind: input, shape index: {}]   ;;  %s1692_s9 = inlined_call_operand.vmem [shape: f32[32,8], index: 9, kind: input, shape index: {}]   ;;  %s1693_s10 = inlined_call_operand.vmem [shape: f32[1,8], index: 10, kind: input, shape index: {}]   ;;  %s1694_s11 = inlined_call_operand.hbm [shape: f32[2,8], index: 11, kind: output, shape index: {}]  }
   0x1   :  { %s1544_s19 = smov 0  }
   0x2 LB: > { %s1254_s20 = sadd.s32 4294967295, %s1469_s19   ;;  %s34_s21 = sadd.s32 1, %s1465_s18  ;;  %s1469_s19 = sphi %s1544_s19, %s22_s19   ;;  %s1465_s18 = sphi %s1542_s18, %s1697_s18   ;;  %s1461_s17 = sphi %s1540_s17, %s1696_s17  }
   0x3   : > { %p36_p0 = scmp.ge.s32.totalorder %s34_s21, 2  ;;  %p1258_p1 = scmp.ge.s32.totalorder %s1469_s19, 1 }
   0x4   : > { %p355_p2 = scmp.lt.s32.totalorder %s1469_s19, 3 }
   0x5   : > { %s1699_s21 = smov (%p36_p0, %s34_s21), 0 }
   0x6   : > { %p356_p3 = pnand %p1258_p1, %p355_p2 }
   0x7   : > { %p404_p4 = scmp.eq.s32.totalorder (!%p356_p3), %s1461_s17, 0 }
   0x8   : > { %359 = sbr.rel (%p356_p3) target bundleno = 1608 (0x648), region = 64 }
   0xd   : > { %409 = sbr.rel (!%p404_p4) target bundleno = 18 (0x12), region = 68  ;;  %vm410_vm0 = vcmask (%p404_p4), 122880   ;;  %vm412_vm1 = vcmask (%p404_p4), 58368   ;;  %v414_v0 = vld [vmem:[%s1686_s3] sm:$0x1] (%p404_p4)  ;;  %v1471_v1 = vmov (%p404_p4), 1.0  }
   0xe   : > { %411 = vst.msk [vmem:[#allocation2] sm:$0x1] (%p404_p4), %vm410_vm0, %v1471_v1  ;;  %v1472_v2 = vmov (%p404_p4), 0.0   ;;  %vm415_vm2 = vcmask (%p404_p4), 253952  }
   0xf   : > { %413 = vst.msk [vmem:[#allocation7] sm:$0x3] (%p404_p4), %vm412_vm1, %v1472_v2 }
  0x10   : > { %416 = vst.msk [vmem:[#allocation5] sm:$0x1] (%p404_p4), %vm415_vm2, %v414_v0 }
  0x12 PF: > { %p417_p5 = scmp.gt.s32.totalorder %s1461_s17, 0 }
  0x13   : > { %v426_v3 = vld [vmem:[%s1685_s2 + $0x18] sm:$0xff] (%p417_p5)  ;;  %v1473_v4 = vmov (%p417_p5), 0.0   ;;  %v425_v5 = vld [vmem:[%s1685_s2 + $0x10] sm:$0xff] (%p417_p5)  ;;  %vm1474_vm3 = vmmov (%p417_p5), 0   ;;  %v424_v6 = vld [vmem:[%s1685_s2 + $0x8] sm:$0xff] (%p417_p5)  ;;  %vm427_vm4 = vcmask (%p417_p5), 261120  }
  0x14   : > { %421 = sbr.rel (!%p417_p5) target bundleno = 223 (0xdf), region = 72  ;;  %1316 = vmatprep.subr.mxu0 (%p417_p5), %v1473_v4  ;;  %1324 = vmatprep.mubr.msk.f32.mxu0 (%p417_p5), %vm1474_vm3, %v1473_v4  ;;  %v423_v7 = vld [vmem:[%s1685_s2] sm:$0xff] (%p417_p5)  ;;  %vm501_vm5 = vcmask (%p417_p5), 253952  }
  0x15   : > { %1317 = vmatpush3.msra.mxu0 (%p417_p5), %v426_v3 }
  0x16   : > { %1318 = vmatprep.subr.mxu0 (%p417_p5), %v1473_v4 }
  0x17   : > { %1319 = vmatpush3.msra.mxu0 (%p417_p5), %v425_v5  ;;  %v422_v8 = vld [vmem:[#allocation5] sm:$0x1] (%p417_p5) }
  0x18   : > { %1320 = vmatprep.subr.mxu0 (%p417_p5), %v1473_v4 }
  0x19   : > { %1321 = vmatpush3.msra.mxu0 %v424_v6 }
  0x1a   : > { %1322 = vmatprep.subr.mxu0 %v1473_v4 }
  0x1b   : > { %1323 = vmatpush3.msra.mxu0 %v423_v7 }
  0x1c   : > { %1325 = vmatmul.mubr.msk.f32.vlgmr.msra.gmra.mxu0 %vm427_vm4, %v422_v8 }
  0xdc   : > { %v497_v9 = vpop.f32.mrf.mxu0 }
  0xdd   : > { %502 = vst.msk [vmem:[#allocation5] sm:$0x1] %vm501_vm5, %v497_v9 }
  0xde   : > { %v1326_v10 = vpop.f32.mrf.mxu0 }
  0xdf PF: > { %v1286_v11 = vld [vmem:[%s1683_s0] sm:$0xff]   ;;  %v1475_v12 = vmov 0.0   ;;  %vm1476_vm6 = vmmov 0   ;;  %vm592_vm7 = vcmask 130048   ;;  %v670_v16 = vld [vmem:[%s1684_s1 + $0x8] sm:$0xff]  ;;  %v510_v18 = vld [vmem:[%s1687_s4 + $0x18] sm:$0xff]  ;;  %v872_v31 = vlaneseq }
  0xe0   : > { %1338 = vmatprep.subr.mxu1 %v1475_v12  ;;  %v1287_v13 = vunpack.c.l.bf16 %v1286_v11  ;;  %v1288_v14 = vunpack.c.h.bf16 %v1286_v11  ;;  %1342 = vmatprep.mubr.msk.f32.mxu1 %vm1476_vm6, %v1475_v12  ;;  %v591_v15 = vld [vmem:[#allocation2] sm:$0x1]  ;;  %v509_v19 = vld [vmem:[%s1687_s4 + $0x10] sm:$0xff]  ;;  %v508_v20 = vld [vmem:[%s1687_s4 + $0x8] sm:$0xff]  ;;  %vm511_vm8 = vcmask 261120   ;;  %vm667_vm9 = vcmask 122880  }
  0xe1   : > { %1327 = vmatprep.subr.mxu0 %v1475_v12  ;;  %1335 = vmatprep.mubr.msk.f32.mxu0 %vm1476_vm6, %v1475_v12  ;;  %v669_v17 = vld [vmem:[%s1684_s1] sm:$0xff]  ;;  %vm585_vm10 = vcmask 24576   ;;  %vm798_vm11 = vcmask 1040384   ;;  %vm747_vm12 = vcmask 8192   ;;  %s1267_s13 = sshll.u32 %s1461_s17, 2  ;;  %v873_v34 = vand.u32 127, %v872_v31 }
  0xe2   : > { %1339 = vmatpush3.msra.mxu1 %v1288_v14  ;;  %1328 = vmatpush3.msra.mxu0 %v510_v18  ;;  %v507_v21 = vld [vmem:[%s1687_s4] sm:$0xff]  ;;  %v877_v32 = vstv %s1267_s13  ;;  %v875_v35 = vshrl.u32 %v872_v31, 7  ;;  %vm887_vm13 = vcmask 1043456   ;;  %vm794_vm15 = vcmask 7168   ;;  %p966_p6 = scmp.eq.s32.totalorder %s1461_s17, 1 }
  0xe3   : > { %1340 = vmatprep.subr.mxu1 %v1475_v12  ;;  %1329 = vmatprep.subr.mxu0 %v1475_v12  ;;  %vm883_vm0 = vcmask 31744   ;;  %v882_v41 = vld [vmem:[#allocation7] sm:$0x3]  ;;  %vm962_vm1 = vcmask 58368   ;;  %v1477_v47 = vmov (%p966_p6), 0.0   ;;  %vm1478_vm2 = vmmov (%p966_p6), 0  }
  0xe4   : > { %1341 = vmatpush3.msra.mxu1 %v1287_v13  ;;  %1330 = vmatpush3.msra.mxu0 %v509_v19  ;;  %v506_v22 = vld [vmem:[#allocation5] sm:$0x1]  ;;  %v878_v36 = vadd.s32 %v877_v32, %v875_v35  ;;  %v1097_v49 = vld [vmem:[%s1692_s9 + $0x18] sm:$0xff] (%p966_p6)  ;;  %v1272_v5 = vld [vmem:[%s1688_s5] ss:$0 sm:$0xff] (%p966_p6)  ;;  %vm1019_vm3 = vcmask (%p966_p6), 64512  }
  0xe5   : > { %1343 = vmatmul.mubr.msk.f32.vlgmr.msra.gmra.mxu1 %vm592_vm7, %v591_v15  ;;  %1345 = vmatprep.subr.mxu1 %v1475_v12  ;;  %v1011_v45 = vld [vmem:[%s1690_s7] sm:$0xff] (%p966_p6)  ;;  %v1096_v10 = vld [vmem:[%s1692_s9 + $0x10] sm:$0xff] (%p966_p6)  ;;  %v1095_v11 = vld [vmem:[%s1692_s9 + $0x8] sm:$0xff] (%p966_p6) }
  0xe6   : > { %1346 = vmatpush3.msra.mxu1 %v670_v16  ;;  %1349 = vmatprep.mubr.msk.f32.mxu1 %vm1476_vm6, %v1475_v12  ;;  %vm879_vm14 = vcmp.eq.s32.totalorder %v873_v34, %v878_v36  ;;  %v1273_v7 = vld [vmem:[%s1689_s6] ss:$0 sm:$0xff] (%p966_p6) }
  0xe7   : > { %1347 = vmatprep.subr.mxu1 %v1475_v12  ;;  %1331 = vmatprep.subr.mxu0 %v1475_v12  ;;  %v1268_v37 = vsel %vm879_vm14, 1.0, %v1475_v12  ;;  %v1274_v13 = vld [vmem:[%s1691_s8] ss:$0 sm:$0xff] (%p966_p6) }
  0xe8   : > { %1348 = vmatpush3.msra.mxu1 %v669_v17  ;;  %1332 = vmatpush3.msra.mxu0 %v508_v20  ;;  %v1276_v18 = vld [vmem:[%s1693_s10] ss:$0 sm:$0xff] (%p966_p6) }
  0xe9   : > { %1357 = vmatprep.subr.mxu1 %v1475_v12  ;;  %1333 = vmatprep.subr.mxu0 %v1475_v12 }
  0xea   : > { %1334 = vmatpush3.msra.mxu0 %v507_v21 }
  0xeb   : > { %1336 = vmatmul.mubr.msk.f32.vlgmr.msra.gmra.mxu0 %vm511_vm8, %v506_v22  ;;  %1352 = vmatprep.subr.mxu0 %v1475_v12 }
  0xec   : > { %1354 = vmatprep.mubr.msk.f32.mxu0 %vm1476_vm6, %v1475_v12 }
 0x1a5   : > { %v662_v23 = vpop.f32.mrf.mxu1 }
 0x1a6   : > { %668 = vst.msk [vmem:[#allocation3] sm:$0x1] %vm667_vm9, %v662_v23  ;;  %1350 = vmatmul.mubr.msk.f32.vlgmr.msra.gmra.mxu1 %vm592_vm7, %v662_v23 }
 0x1a7   : > { %v1344_v24 = vpop.f32.mrf.mxu1  ;;  %1359 = vmatprep.mubr.msk.f32.mxu1 %vm1476_vm6, %v1475_v12  ;;  %1358 = vmatpush3.msk.msra.mxu1 %vm887_vm13, %v1268_v37  ;;  %v1094_v12 = vld [vmem:[%s1692_s9] sm:$0xff] (%p966_p6) }
 0x1a8   : > { %1367 = vmatprep.subr.mxu1 (%p966_p6), %v1477_v47 }
 0x1ab   : > { %v581_v26 = vpop.f32.mrf.mxu0 }
 0x1ac   : > { %586 = vst.msk [vmem:[#allocation6] sm:$0x1] %vm585_vm10, %v581_v26 }
 0x1ad   : > { %v964_v25 = vld [vmem:[#allocation3] sm:$0x1]  ;;  %v1337_v27 = vpop.f32.mrf.mxu0 }
 0x1ae   : > { %965 = vst.msk [vmem:[#allocation2] sm:$0x1] %vm667_vm9, %v964_v25 }
 0x1b3   : > { %v761_v28 = vld [vmem:[#allocation6] sm:$0x1] }
 0x1b4   : > { %1353 = vmatpush3.msk.msra.mxu0 %vm798_vm11, %v761_v28 }
 0x1b5   : > { %1362 = vmatprep.subr.mxu0 (%p966_p6), %v1477_v47 }
 0x266   : > { %v740_v29 = vpop.f32.mrf.mxu1 }
 0x267   : > { %748 = vst.msk [vmem:[#allocation4] sm:$0x1] %vm747_vm12, %v740_v29 }
 0x268   : > { %v1351_v30 = vpop.f32.mrf.mxu1 }
 0x26e   : > { %v760_v33 = vld [vmem:[#allocation4] sm:$0x1] }
 0x26f   : > { %762 = vxpose.xlu0.b32.start.end [1/1] (short) (narrow) %v760_v33, 8 }
 0x2eb   : > { %v778_v38 = vpop.trf.xlu0 }
 0x2ec   : > { %1355 = vmatmul.mubr.msk.f32.vlgmr.msra.gmra.mxu0 %vm794_vm15, %v778_v38 }
 0x2ed   : > { %1364 = vmatprep.mubr.msk.f32.mxu0 (%p966_p6), %vm1478_vm2, %v1477_v47  ;;  %1363 = vmatpush3.msra.mxu0 (%p966_p6), %v1011_v45 }
 0x3ac   : > { %v868_v39 = vpop.f32.mrf.mxu0 }
 0x3ad   : > { %1360 = vmatmul.mubr.msk.f32.vlgmr.msra.gmra.mxu1 %vm883_vm0, %v868_v39 }
 0x3ae   : > { %v1356_v40 = vpop.f32.mrf.mxu0  ;;  %1368 = vmatpush3.msra.mxu1 (%p966_p6), %v1097_v49  ;;  %1375 = vmatprep.mubr.msk.f32.mxu1 (%p966_p6), %vm1478_vm2, %v1477_v47 }
 0x3af   : > { %1369 = vmatprep.subr.mxu1 (%p966_p6), %v1477_v47 }
 0x3b0   : > { %1370 = vmatpush3.msra.mxu1 (%p966_p6), %v1096_v10 }
 0x3b1   : > { %1371 = vmatprep.subr.mxu1 (%p966_p6), %v1477_v47 }
 0x3b2   : > { %1372 = vmatpush3.msra.mxu1 (%p966_p6), %v1095_v11 }
 0x3b3   : > { %1373 = vmatprep.subr.mxu1 (%p966_p6), %v1477_v47 }
 0x3b4   : > { %1374 = vmatpush3.msra.mxu1 (%p966_p6), %v1094_v12 }
 0x46c   : > { %970 = sbr.rel (!%p966_p6) target bundleno = 1593 (0x639), region = 92 }
 0x46d   : > { %v957_v42 = vpop.f32.mrf.mxu1 }
 0x46e   : > { %v961_v43 = vadd.f32 %v957_v42, %v882_v41 }
 0x46f   : > { %v1361_v44 = vpop.f32.mrf.mxu1 }
 0x470   : > { %963 = vst.msk [vmem:[#allocation7] sm:$0x3] %vm962_vm1, %v961_v43 }
 0x477   : > { %v971_v46 = vld [vmem:[#allocation7] sm:$0x3] }
 0x478   : > { %v973_v48 = vsel %vm962_vm1, %v971_v46, 0.0 }
 0x479   : > { %v974_v50 = vrot.slane %v973_v48, 4 }
 0x47b   : > { %v975_v51 = vadd.f32 %v974_v50, %v973_v48 }
 0x47d   : > { %v976_v52 = vrot.slane %v975_v51, 2 }
 0x47f   : > { %v977_v53 = vadd.f32 %v976_v52, %v975_v51 }
 0x481   : > { %v978_v54 = vrot.slane %v977_v53, 1 }
 0x483   : > { %v979_v55 = vadd.f32 %v978_v54, %v977_v53 }
 0x485   : > { %v981_v56 = vmul.f32 0.5, %v979_v55 }
 0x487   : > { %v982_v57 = vsub.f32 %v971_v46, %v981_v56 }
 0x489   : > { %v983_v58 = vmul.f32 %v982_v57, %v982_v57 }
 0x48b   : > { %v984_v59 = vsel %vm962_vm1, %v983_v58, 0.0 }
 0x48c   : > { %v985_v60 = vrot.slane %v984_v59, 4 }
 0x48e   : > { %v986_v61 = vadd.f32 %v985_v60, %v984_v59 }
 0x490   : > { %v987_v62 = vrot.slane %v986_v61, 2 }
 0x492   : > { %v988_v63 = vadd.f32 %v987_v62, %v986_v61 }
 0x494   : > { %v989_v0 = vrot.slane %v988_v63, 1 }
 0x496   : > { %v990_v1 = vadd.f32 %v989_v0, %v988_v63 }
 0x498   : > { %v991_v2 = vmul.f32 0.5, %v990_v1 }
 0x49a   : > { %v992_v3 = vadd.f32 1e-05, %v991_v2 }
 0x49c   : > { %1417 = vrsqrt.f32 %v992_v3 }
 0x4a9   : > { %v1418_v4 = vpop.eup %1417 }
 0x4aa   : > { %v994_v6 = vmul.f32 %v1418_v4, %v982_v57 }
 0x4ac   : > { %v1002_v8 = vmul.f32 %v1272_v5, %v994_v6 }
 0x4ae   : > { %v1010_v9 = vadd.f32 %v1273_v7, %v1002_v8 }
 0x4b0   : > { %1365 = vmatmul.mubr.msk.f32.vlgmr.msra.gmra.mxu0 %vm1019_vm3, %v1010_v9 }
 0x570   : > { %v1089_v14 = vpop.f32.mrf.mxu0 }
 0x571   : > { %v1090_v15 = vadd.f32 %v1274_v13, %v1089_v14 }
 0x572   : > { %v1366_v16 = vpop.f32.mrf.mxu0 }
 0x573   : > { %v1093_v17 = vmax.f32 %v1090_v15, 0.0 }
 0x575   : > { %1376 = vmatmul.mubr.msk.f32.vlgmr.msra.gmra.mxu1 %vm511_vm8, %v1093_v17 }
 0x635   : > { %v1175_v19 = vpop.f32.mrf.mxu1 }
 0x636   : > { %v1176_v20 = vadd.f32 %v1276_v18, %v1175_v19 }
 0x637   : > { %v1377_v21 = vpop.f32.mrf.mxu1 }
 0x638   : > { %1179 = vst.msk [vmem:[#allocation8] sm:$0x3] %vm962_vm1, %v1176_v20 }
 0x639 PF: > { %p1659_p7 = scmp.eq.s32.totalorder %s1254_s20, 1  ;;  %s1479_s22 = smov [#allocation8]  }
 0x63a   : > { %s1187_s23 = sshll.u32 %s1479_s22, 4  ;;  %s1188_s23 = int_to_ptr.vmem [resolvable:$true] %s1187_s23 }
 0x63b   : > { %s1419_s24 = scalar_lea.vmem %s1188_s23, 32  ;;  %p1426_p11 = scmp.lt.s32.totalorder %s1188_s23, %s1188_s23 }
 0x63c   : > { %p1420_p8 = scmp.ne.s32.totalorder %s1188_s23, %s1419_s24  ;;  %p1427_p12 = scmp.lt.s32.totalorder %s1419_s24, %s1419_s24 }
 0x63e   : > { %p1421_p9 = pnand %p1420_p8, %p1659_p7  ;;  %p1428_p13 = por %p1427_p12, %p1426_p11 }
 0x640   : > { %p1422_p10 = pneg %p1421_p9 }
 0x642   : > { %p1429_p0 = pnand %p1428_p13, %p1422_p10 }
 0x644   : > { %1432 = shalt.err (!%p1429_p0)
}
 0x645   : > { %1379 = dma.vmem_to_hbm [thread:$0]  (%p1659_p7), %s1188_s23, 32, %s1694_s11, [#allocation9]  }
 0x646   : > { %1456 = dma.done.wait (%p1659_p7), [#allocation9], 32  }
 0x647   : > { %1458 = vsyncadd (%p1659_p7), [#allocation9], 4294967264 }
 0x648 PF: > { %s22_s19 = sadd.s32 1, %s1469_s19   ;;  %s1696_s17 = smov %s1465_s18 }
 0x649   : > { %p19_p1 = scmp.ge.s32.totalorder %s22_s19, 4   ;;  %s1697_s18 = smov %s1699_s21 }
 0x64b   :  { %21 = sbr.rel (!%p19_p1) target bundleno = 2 (0x2), region = 123 }
 0x650   :  { %1200 = vsyncpa [#allocation9], 1 }
 0x651   :  { %1202 = vsyncpa [#allocation9 + $0x1], 1 }

</bundles_post_ra>
